<compile_context>
chip_gen: v7x
topology: tpu7x:2x2x1
jax: 0.10.0
libtpu: 0.0.40
codegen_flags: <defaults>
</compile_context>

<pallas_src>
import numpy as np
import jax
import jax.numpy as jnp
import jax.scipy.linalg as jsl
from jax import lax
from jax.experimental import pallas as pl
from jax.experimental.pallas import tpu as pltpu


def _invconv1x1_kernel(w_ref, x_ref, y_ref):
    # w_ref: (Bb, R, R) broadcast block-diagonal weight in VMEM (constant
    #        index_map -> fetched once and kept resident by the pipeline).
    # x_ref / y_ref: (Bb, R, T) lane-dense pixel tiles (~2 MiB).
    # Batched matmul over Bb (no kron blow-up); K = R <= 64 so the MXU work is
    # hidden under the HBM DMA even with HIGHEST (multi-pass f32).
    y_ref[...] = jnp.einsum(
        "brc,bct->brt", w_ref[...], x_ref[...],
        precision=lax.Precision.HIGHEST,
        preferred_element_type=jnp.float32,
    ).astype(y_ref.dtype)


def _assemble_weight(params):
    """W = P @ ((L*lmask + I) @ (U*umask + diag(sign_s*exp(log_s)))); rows = out-ch."""
    wl = params["l"] * params["lmask"] + params["eye"]
    wu = params["u"] * params["umask"] + jnp.diag(
        params["sign_s"] * jnp.exp(params["log_s"]))
    return jnp.dot(params["permutated"],
                   jnp.dot(wl, wu, precision=lax.Precision.HIGHEST),
                   precision=lax.Precision.HIGHEST)


def _pick_batch_group(batch, nf, max_rows=64):
    """Largest divisor g of batch with g*nf <= max_rows (rows land on sublanes).

    R = g*nf <= 64 keeps the kron(I_g, W) weight tiny and K within one MXU
    tile (no wasted K-passes); remaining batching goes to the Bb block axis.
    """
    best = 1
    for g in range(1, batch + 1):
        if batch % g == 0 and g * nf <= max_rows:
            best = g
    return best


def _choose_tiles(num_groups, rows, hw, *, target_bytes=2 << 20, max_bb=16,
                  elem_bytes=4):
    """Pick (Bb, T) so one block is ~target_bytes (>= 1 MiB when data allows).

    Pixel tile T grows first (lane axis, cheapest); then whole batch groups are
    folded onto the leading Bb axis (capped at 16 so the in-kernel batched
    matmul stays small).  Capping blocks at ~2 MiB keeps 2-in + 2-out buffers
    around 8 MiB (fits every generation's scoped VMEM) and leaves realistic
    workloads with several grid steps for v7x's two TensorCores.
    """
    LANE = 128
    row_bytes = rows * elem_bytes
    max_t = max(LANE, (target_bytes // row_bytes) // LANE * LANE)
    if hw <= max_t:
        T = hw                      # whole pixel row: full-dim block, always legal
    else:
        T = max_t                   # multiple of 128; ragged tail masked by Pallas
    bb_cap = min(max_bb, max(1, target_bytes // (rows * T * elem_bytes)))
    Bb = 1
    for d in range(1, num_groups + 1):
        if num_groups % d == 0 and d <= bb_cap:
            Bb = d
    return Bb, T


def invertible_conv_lu_1d_forward(x, params):
    """Forward pass of InvertibleConvLU1d (reverse=False). x is NCHW float32."""
    B, C, H, W = x.shape
    nf = C
    assert params["l"].shape == (nf, nf)

    # x-independent pieces hoisted out of the kernel: weight assembly + logdet.
    weight = _assemble_weight(params)                                  # (nf, nf)
    logdet = (jnp.sum(params["log_s"]) * (H * W)) * jnp.ones((B,), jnp.float32)

    # Pack G batch elements per group so the sublane/row dim is dense; the
    # channel contraction within a group is one block-diagonal matmul.
    G = _pick_batch_group(B, nf)
    R = G * nf                                                         # rows/group
    NB = B // G
    w_bd = jnp.kron(jnp.eye(G, dtype=weight.dtype), weight)            # (R, R)

    # Pixels on the lane axis; free reshape of contiguous NCHW (no transposes,
    # no pad, no slice).
    HW = H * W
    x_r = x.reshape(NB, R, HW)

    # ~2 MiB blocks: big pixel tile + Bb batch groups per block.
    Bb, T = _choose_tiles(NB, R, HW)
    w_bc = jnp.broadcast_to(w_bd, (Bb, R, R))        # tiny; resident across steps

    grid = (NB // Bb, pl.cdiv(HW, T))                # pixel axis innermost

    y_r = pl.pallas_call(
        _invconv1x1_kernel,
        out_shape=jax.ShapeDtypeStruct((NB, R, HW), jnp.float32),
        grid=grid,
        in_specs=[
            pl.BlockSpec((Bb, R, R), lambda g, i: (0, 0, 0)),   # weight (resident)
            pl.BlockSpec((Bb, R, T), lambda g, i: (g, 0, i)),   # x tile
        ],
        out_specs=pl.BlockSpec((Bb, R, T), lambda g, i: (g, 0, i)),
        compiler_params=pltpu.CompilerParams(
            dimension_semantics=("parallel", "parallel"),
            vmem_limit_bytes=32 * 1024 * 1024),
        cost_estimate=pl.CostEstimate(
            flops=2 * B * HW * nf * nf,
            transcendentals=0,
            bytes_accessed=2 * B * nf * HW * 4 + Bb * R * R * 4),
    )(w_bc, x_r)

    # Free reshape back to NCHW (no trailing slice: the output was never padded).
    y = y_r.reshape(B, nf, H, W)
    return y, logdet


def make_params(nf, seed=0):
    """Deterministic re-implementation of InvertibleConvLU1d.__init__."""
    rng = np.random.RandomState(seed)
    w_init = np.linalg.qr(rng.randn(nf, nf))[0].astype(np.float32)
    p, l, u = jsl.lu(jnp.asarray(w_init))               # w_init = p @ l @ u
    s = jnp.diag(u)
    u = jnp.triu(u, k=1)
    lmask = jnp.tril(jnp.ones((nf, nf), jnp.float32), -1)
    return {
        "permutated": p.astype(jnp.float32),
        "sign_s": jnp.sign(s).astype(jnp.float32),
        "lmask": lmask,
        "umask": lmask.T,
        "eye": jnp.eye(nf, dtype=jnp.float32),
        "l": l.astype(jnp.float32),
        "u": u.astype(jnp.float32),
        "log_s": jnp.log(jnp.abs(s)).astype(jnp.float32),
    }


def reference_forward(x, params):
    """Pure-JAX reference mirroring the PyTorch forward (reverse=False)."""
    B, C, H, W = x.shape
    weight = _assemble_weight(params)                   # (out_ch, in_ch)
    y = jnp.einsum("oc,bchw->bohw", weight, x, precision=lax.Precision.HIGHEST)
    logdet = jnp.sum(params["log_s"]) * (H * W) * jnp.ones((B,), jnp.float32)
    return y, logdet


if __name__ == "__main__":
    nf = 4
    B, H, W = 2, 16, 16
    params = make_params(nf, seed=0)

    key = jax.random.PRNGKey(0)
    x = jax.random.normal(key, (B, nf, H, W), dtype=jnp.float32)

    y, logdet = invertible_conv_lu_1d_forward(x, params)
    y = jax.block_until_ready(y)
    logdet = jax.block_until_ready(logdet)

    y_ref, logdet_ref = reference_forward(x, params)
    assert y.shape == (B, nf, H, W) and logdet.shape == (B,)
    np.testing.assert_allclose(np.asarray(y), np.asarray(y_ref),
                               rtol=1e-4, atol=1e-4)
    np.testing.assert_allclose(np.asarray(logdet), np.asarray(logdet_ref),
                               rtol=1e-5, atol=1e-5)
    print("KERNEL_OK")
</pallas_src>

<mosaic_0001>
module attributes {stable_mosaic.version = 11 : i64} {
  func.func @_invconv1x1_kernel(%arg0: i32, %arg1: i32, %arg2: memref<1x8x8xf32, #tpu.memory_space<vmem>>, %arg3: memref<1x8x256xf32, #tpu.memory_space<vmem>>, %arg4: memref<1x8x256xf32, #tpu.memory_space<vmem>>) attributes {dimension_semantics = [#tpu.dimension_semantics<parallel>, #tpu.dimension_semantics<parallel>], iteration_bounds = array<i64: 1, 1>, scalar_prefetch = 0 : i64, scratch_operands = 0 : i64, tpu.core_type = #tpu.core_type<tc>, window_params = [{pipeline_mode = #tpu.pipeline_mode<synchronous>, transform_indices = @transform_0, window_bounds = array<i64: 1, 8, 8>}, {transform_indices = @transform_1, window_bounds = array<i64: 1, 8, 256>}, {transform_indices = @transform_2, window_bounds = array<i64: 1, 8, 256>}]} {
    %c0 = arith.constant 0 : index
    %c0_0 = arith.constant 0 : index
    %c0_1 = arith.constant 0 : index
    %0 = vector.load %arg2[%c0, %c0_0, %c0_1] : memref<1x8x8xf32, #tpu.memory_space<vmem>>, vector<1x8x8xf32>
    %c0_2 = arith.constant 0 : index
    %c0_3 = arith.constant 0 : index
    %c0_4 = arith.constant 0 : index
    %1 = vector.load %arg3[%c0_2, %c0_3, %c0_4] : memref<1x8x256xf32, #tpu.memory_space<vmem>>, vector<1x8x256xf32>
    "tpu.trace_start"() <{level = 10 : i32, message = "brc,bct->brt"}> : () -> ()
    %cst = arith.constant dense<0.000000e+00> : vector<1x8x256xf32>
    %2 = tpu.matmul %0, %1, %cst {dimension_numbers = #tpu.dot_dimension_numbers<[2], [1], [1], [2], [0, 0, 0, 1, 1, 2], [0], [0]>, precision = #tpu.contract_precision<fp32>} : vector<1x8x8xf32>, vector<1x8x256xf32>, vector<1x8x256xf32> -> vector<1x8x256xf32>
    "tpu.trace_stop"() : () -> ()
    %c0_5 = arith.constant 0 : index
    %c0_6 = arith.constant 0 : index
    %c0_7 = arith.constant 0 : index
    %3 = vector.load %arg4[%c0_5, %c0_6, %c0_7] : memref<1x8x256xf32, #tpu.memory_space<vmem>>, vector<1x8x256xf32>
    tpu.vector_store %arg4[%c0_5, %c0_6, %c0_7], %2 {strides = array<i32>} : memref<1x8x256xf32, #tpu.memory_space<vmem>>, vector<1x8x256xf32>,
    return
  }
  func.func @transform_0(%arg0: i32, %arg1: i32) -> (i32, i32, i32) {
    %c0_i32 = arith.constant 0 : i32
    %c0_i32_0 = arith.constant 0 : i32
    %c0_i32_1 = arith.constant 0 : i32
    %c0_i32_2 = arith.constant 0 : i32
    return %c0_i32, %c0_i32_0, %c0_i32_1 : i32, i32, i32
  }
  func.func @transform_1(%arg0: i32, %arg1: i32) -> (i32, i32, i32) {
    %c0_i32 = arith.constant 0 : i32
    %c0_i32_0 = arith.constant 0 : i32
    return %arg0, %c0_i32, %arg1 : i32, i32, i32
  }
  func.func @transform_2(%arg0: i32, %arg1: i32) -> (i32, i32, i32) {
    %c0_i32 = arith.constant 0 : i32
    %c0_i32_0 = arith.constant 0 : i32
    return %arg0, %c0_i32, %arg1 : i32, i32, i32
  }
}

</mosaic_0001>

<bundles_post_ra>
// kernel: tpu_custom_call.1
= control target key start
LH: loop header
LB: loop body
LE: loop exit
PB: predicated region body
PF: predicated region fallthrough
CT: control target
= control target key end

     0   :  { %7 = vsyncpa [#allocation3], 0  ;;  %s667_s0 = inlined_call_operand.hbm [shape: f32[1,8,8], index: 0, kind: input, shape index: {}]   ;;  %s668_s1 = inlined_call_operand.hbm [shape: f32[1,8,256], index: 1, kind: input, shape index: {}]   ;;  %s669_s2 = inlined_call_operand.hbm [shape: f32[1,8,256], index: 2, kind: output, shape index: {}]  }
   0x1   :  { %8 = vsyncpa [#allocation6], 0 }
   0x2   :  { %9 = vsyncpa [#allocation4], 0  ;;  %s612_s9 = smov [#allocation2]   ;;  %s613_s11 = smov [#allocation5]  }
   0x3   :  { %s16_s10 = sshll.u32 %s612_s9, 4  ;;  %s26_s12 = sshll.u32 %s613_s11, 4  ;;  %s17_s10 = int_to_ptr.vmem [resolvable:$true] %s16_s10  ;;  %s27_s12 = int_to_ptr.vmem [resolvable:$true] %s26_s12 }
   0x4   :  { %s540_s15 = scalar_lea.hbm %s667_s0, 128 }
   0x5   :  { %p541_p0 = scmp.ne.s32.totalorder %s667_s0, %s540_s15  ;;  %p544_p1 = scmp.lt.u32.totalorder %s540_s15, %s667_s0 }
   0x7   :  { %p546_p2 = pnand %p544_p1, %p541_p0 }
   0x9   :  { %549 = shalt.err (!%p546_p2)
}
   0xa   :  { %s550_s20 = scalar_lea.vmem %s17_s10, 128  ;;  %p555_p4 = scmp.lt.s32.totalorder %s17_s10, %s17_s10 }
   0xb   :  { %p551_p3 = scmp.ne.s32.totalorder %s17_s10, %s550_s20  ;;  %p556_p5 = scmp.lt.s32.totalorder %s550_s20, %s550_s20 }
   0xd   :  { %p557_p6 = por %p556_p5, %p555_p4 }
   0xf   :  { %p558_p7 = pnand %p557_p6, %p551_p3 }
  0x11   :  { %561 = shalt.err (!%p558_p7)
}
  0x12   :  { %19 = dma.hbm_to_vmem [thread:$0]  %s667_s0, 128, %s17_s10, [#allocation3]  }
  0x13   :  { %s562_s25 = scalar_lea.hbm %s668_s1, 256 }
  0x14   :  { %p563_p8 = scmp.ne.s32.totalorder %s668_s1, %s562_s25  ;;  %p566_p9 = scmp.lt.u32.totalorder %s562_s25, %s668_s1 }
  0x16   :  { %p568_p10 = pnand %p566_p9, %p563_p8 }
  0x18   :  { %571 = shalt.err (!%p568_p10)
}
  0x19   :  { %s572_s30 = scalar_lea.vmem %s27_s12, 256  ;;  %p577_p12 = scmp.lt.s32.totalorder %s27_s12, %s27_s12 }
  0x1a   :  { %p573_p11 = scmp.ne.s32.totalorder %s27_s12, %s572_s30  ;;  %p578_p13 = scmp.lt.s32.totalorder %s572_s30, %s572_s30 }
  0x1c   :  { %p579_p0 = por %p578_p13, %p577_p12 }
  0x1e   :  { %p580_p1 = pnand %p579_p0, %p573_p11 }
  0x20   :  { %583 = shalt.err (!%p580_p1)
}
  0x21   :  { %29 = dma.hbm_to_vmem [thread:$0]  %s668_s1, 256, %s27_s12, [#allocation6]  }
  0x22   :  { %606 = dma.done.wait [#allocation3], 128  }
  0x23   :  { %607 = vsyncadd [#allocation3], 4294967168 }
  0x24   :  { %608 = dma.done.wait [#allocation6], 256  }
  0x25   :  { %609 = vsyncadd [#allocation6], 4294967040  ;;  %v614_v0 = vmov 0.0   ;;  %vm39_vm0 = vcmask 64512   ;;  %v38_v1 = vld [vmem:[#allocation5 + $0x8] sm:$0xff]  ;;  %v37_v2 = vld [vmem:[#allocation5] sm:$0xff] }
  0x26   :  { %346 = vmatprep.mubr.f32.mxu0 %v614_v0  ;;  %109 = vmatprep.mubr.f32.mxu1 %v614_v0  ;;  %v36_v3 = vld [vmem:[#allocation2] sm:$0xff]  ;;  %v43_v4 = vand.u32 4294901760, %v38_v1  ;;  %v45_v5 = vand.u32 4294901760, %v37_v2  ;;  %s615_s1 = smov [#allocation7]  }
  0x27   :  { %v41_v6 = vsel %vm39_vm0, %v36_v3, 0  ;;  %s516_s4 = sshll.u32 %s615_s1, 4  ;;  %s517_s4 = int_to_ptr.vmem [resolvable:$true] %s516_s4 }
  0x28   :  { %v110_v7 = vand.u32 4294901760, %v41_v6  ;;  %281 = vmatprep.subr.mxu0 %v43_v4  ;;  %v128_v8 = vsub.f32 %v37_v2, %v45_v5  ;;  %44 = vmatprep.subr.mxu1 %v43_v4  ;;  %v122_v9 = vsub.f32 %v38_v1, %v43_v4  ;;  %s584_s5 = scalar_lea.vmem %s517_s4, 256  ;;  %p589_p3 = scmp.lt.s32.totalorder %s517_s4, %s517_s4 }
  0x29   :  { %283 = vmatpush1.msra.mxu0 %v45_v5  ;;  %46 = vmatpush1.msra.mxu1 %v45_v5  ;;  %p585_p2 = scmp.ne.s32.totalorder %s517_s4, %s584_s5  ;;  %p590_p4 = scmp.lt.s32.totalorder %s584_s5, %s584_s5 }
  0x2a   :  { %v111_v10 = vsub.f32 %v41_v6, %v110_v7  ;;  %v123_v11 = vand.u32 4294901760, %v122_v9  ;;  %v129_v12 = vand.u32 4294901760, %v128_v8 }
  0x2b   :  { %p591_p5 = por %p590_p4, %p589_p3 }
  0x2c   :  { %v112_v13 = vand.u32 4294901760, %v111_v10  ;;  %v124_v14 = vsub.f32 %v122_v9, %v123_v11  ;;  %359 = vmatprep.subr.mxu0 %v123_v11  ;;  %v130_v15 = vsub.f32 %v128_v8, %v129_v12 }
  0x2d   :  { %p592_p6 = pnand %p591_p5, %p585_p2 }
  0x2e   :  { %350 = vmatmul.mubr.f32.vlgmr.msra.gmra.mrb[0].mxu0 %v112_v13  ;;  %v113_v16 = vsub.f32 %v111_v10, %v112_v13  ;;  %v125_v17 = vand.u32 4294901760, %v124_v14  ;;  %v131_v18 = vand.u32 4294901760, %v130_v15 }
  0x2f   :  { %363 = vmatpush1.msra.mxu0 %v129_v12  ;;  %426 = vmatprep.mubr.f32.mxu0 %v614_v0 }
  0x30   :  { %v114_v19 = vand.u32 4294901760, %v113_v16  ;;  %435 = vmatprep.subr.mxu0 %v43_v4  ;;  %126 = vmatprep.subr.mxu1 %v125_v17 }
  0x32   :  { %115 = vmatmul.mubr.f32.vlgmr.msra.gmra.mrb[0].mxu1 %v114_v19 }
  0x33   :  { %132 = vmatpush1.msra.mxu1 %v131_v18  ;;  %195 = vmatprep.mubr.f32.mxu1 %v614_v0 }
  0x34   :  { %205 = vmatprep.subr.mxu1 %v122_v9 }
  0x36   :  { %428 = vmatmul.mubr.f32.vlgmr.msra.gmra.mrb[0].mxu0 %v110_v7 }
  0x37   :  { %437 = vmatpush1.msra.mxu0 %v45_v5  ;;  %500 = vmatprep.mubr.f32.mxu0 %v614_v0 }
  0x3a   :  { %197 = vmatmul.mubr.f32.vlgmr.msra.gmra.mrb[0].mxu1 %v110_v7 }
  0x3b   :  { %208 = vmatpush1.msra.mxu1 %v128_v8  ;;  %271 = vmatprep.mubr.f32.mxu1 %v614_v0 }
  0x3e   :  { %502 = vmatmul.mubr.f32.vlgmr.msra.gmra.mrb[0].mxu0 %v110_v7 }
  0x42   :  { %274 = vmatmul.mubr.f32.vlgmr.msra.gmra.mrb[0].mxu1 %v111_v10 }
 0x111   :  { %v503_v20 = vpop.f32.mrb[0].mxu0 }
 0x112   :  { %v505_v21 = vpop.f32.mrb[1].mxu0 }
 0x115   :  { %v275_v22 = vpop.f32.mrb[0].mxu1 }
 0x116   :  { %v526_v23 = vadd.f32 %v503_v20, %v275_v22  ;;  %v277_v24 = vpop.f32.mrb[1].mxu1 }
 0x117   :  { %v527_v25 = vadd.f32 %v505_v21, %v277_v24 }
 0x118   :  { %508 = vst [vmem:[#allocation7] sm:$0xff] %v526_v23 }
 0x119   :  { %509 = vst [vmem:[#allocation7 + $0x8] sm:$0xff] %v527_v25 }
 0x11a   :  { %595 = shalt.err (!%p592_p6)
}
 0x11b   :  { %s596_s8 = scalar_lea.hbm %s669_s2, 256 }
 0x11c   :  { %p597_p7 = scmp.ne.s32.totalorder %s669_s2, %s596_s8  ;;  %p600_p8 = scmp.lt.u32.totalorder %s596_s8, %s669_s2 }
 0x11e   :  { %p602_p9 = pnand %p600_p8, %p597_p7 }
 0x120   :  { %605 = shalt.err (!%p602_p9)
}
 0x121   :  { %519 = dma.vmem_to_hbm [thread:$0]  %s517_s4, 256, %s669_s2, [#allocation4]  }
 0x122   :  { %610 = dma.done.wait [#allocation4], 256  }
 0x123   :  { %611 = vsyncadd [#allocation4], 4294967040 }
 0x124   :  { %523 = vsyncpa [#allocation3], 1 }
 0x125   :  { %524 = vsyncpa [#allocation6], 1 }
 0x126   :  { %525 = vsyncpa [#allocation4], 1 }

</bundles_post_ra>
